<compile_context>
chip_gen: v5e
topology: v5e:2x2
jax: 0.10.0
libtpu: 0.0.40
codegen_flags: <defaults>
</compile_context>

<pallas_src>
import numpy as np
import jax
import jax.numpy as jnp
from jax.experimental import pallas as pl
from jax.experimental.pallas import tpu as pltpu


# ---------------------------------------------------------------------------
# Bilinear interpolation matrices (PyTorch F.interpolate, align_corners=False)
# ---------------------------------------------------------------------------

def _bilinear_matrix(out_size, in_size):
    o = np.arange(out_size, dtype=np.float64)
    scale = in_size / out_size
    src = np.maximum((o + 0.5) * scale - 0.5, 0.0)
    x0 = np.minimum(np.floor(src).astype(np.int64), in_size - 1)
    x1 = np.minimum(x0 + 1, in_size - 1)
    frac = src - x0
    W = np.zeros((out_size, in_size), dtype=np.float32)
    W[np.arange(out_size), x0] += (1.0 - frac).astype(np.float32)
    W[np.arange(out_size), x1] += frac.astype(np.float32)
    return W                                              # (out_size, in_size)


def _upsample_matrix(h_in, w_in, h_out, w_out):
    # M[(h*w_in + wi), (o*w_out + p)] = Wh[o, h] * Ww[p, wi]
    Wh = _bilinear_matrix(h_out, h_in)
    Ww = _bilinear_matrix(w_out, w_in)
    return jnp.asarray(np.kron(Wh.T, Ww.T), jnp.float32)  # (h*w, Hout*Wout)


def _mosaic_params(block_bytes):
    return pltpu.CompilerParams(
        dimension_semantics=("parallel",),
        vmem_limit_bytes=max(16 * 1024 * 1024, 4 * int(block_bytes)))


# ---------------------------------------------------------------------------
# Fused forward kernel: per image, everything stays in VMEM.
#   x_ref     : (1, Cin, P)      stride-2 subsampled input, channel-first flat
#   wbbT_ref  : (Cf, Cin)        backbone 1x1-conv weight (transposed)
#   bbb_ref   : (Cf, 1)          backbone bias
#   wclsT_ref : (NC, Cf)         classifier weight, channel-mask already folded
#   bcls_ref  : (NC, 1)          classifier bias
#   up_ref    : (P, Hout*Wout)   kron(Wh^T, Ww^T) bilinear upsample matrix
#   o_ref     : (1, NC, Hout*Wout)  NCHW-flat logits (lane-dense store)
# ---------------------------------------------------------------------------

def _fused_forward_kernel(x_ref, wbbT_ref, bbb_ref, wclsT_ref, bcls_ref,
                          up_ref, o_ref):
    x = x_ref[0]                                                    # (Cin, P)
    feat = jnp.dot(wbbT_ref[...], x, preferred_element_type=jnp.float32)
    feat = jnp.maximum(feat + bbb_ref[...], 0.0)                    # (Cf, P)
    logits = jnp.dot(wclsT_ref[...], feat,
                     preferred_element_type=jnp.float32) + bcls_ref[...]  # (NC, P)
    out = jnp.dot(logits, up_ref[...],
                  preferred_element_type=jnp.float32)               # (NC, H*W)
    o_ref[0] = out.astype(o_ref.dtype)


def _fused_forward_call(xds, wbbT, bbb, wclsT, bcls, upmat, num_classes):
    B, Cin, P = xds.shape
    Cf = wbbT.shape[0]
    HW = upmat.shape[1]
    block_bytes = 4 * (Cin * P + Cf * Cin + Cf + num_classes * Cf
                       + num_classes + P * HW + num_classes * HW)
    return pl.pallas_call(
        _fused_forward_kernel,
        out_shape=jax.ShapeDtypeStruct((B, num_classes, HW), jnp.float32),
        grid_spec=pltpu.PrefetchScalarGridSpec(
            num_scalar_prefetch=0,
            grid=(B,),
            in_specs=[
                pl.BlockSpec((1, Cin, P), lambda n: (n, 0, 0)),
                pl.BlockSpec((Cf, Cin), lambda n: (0, 0)),
                pl.BlockSpec((Cf, 1), lambda n: (0, 0)),
                pl.BlockSpec((num_classes, Cf), lambda n: (0, 0)),
                pl.BlockSpec((num_classes, 1), lambda n: (0, 0)),
                pl.BlockSpec((P, HW), lambda n: (0, 0)),
            ],
            out_specs=pl.BlockSpec((1, num_classes, HW), lambda n: (n, 0, 0)),
        ),
        compiler_params=_mosaic_params(block_bytes),
    )(xds, wbbT, bbb, wclsT, bcls, upmat)


# ---------------------------------------------------------------------------
# Fused latent kernel: backbone + AdaptiveAvgPool2d((1,1)) per image.
# ---------------------------------------------------------------------------

def _latent_kernel(x_ref, wbbT_ref, bbb_ref, o_ref):
    x = x_ref[0]                                                    # (Cin, P)
    feat = jnp.dot(wbbT_ref[...], x, preferred_element_type=jnp.float32)
    feat = jnp.maximum(feat + bbb_ref[...], 0.0)                    # (Cf, P)
    inv_p = 1.0 / float(x_ref.shape[2])
    o_ref[0] = (jnp.sum(feat, axis=1, keepdims=True) * inv_p).astype(o_ref.dtype)


def _latent_call(xds, wbbT, bbb):
    NB, Cin, P = xds.shape
    Cf = wbbT.shape[0]
    block_bytes = 4 * (Cin * P + Cf * Cin + Cf + Cf)
    return pl.pallas_call(
        _latent_kernel,
        out_shape=jax.ShapeDtypeStruct((NB, Cf, 1), jnp.float32),
        grid_spec=pltpu.PrefetchScalarGridSpec(
            num_scalar_prefetch=0,
            grid=(NB,),
            in_specs=[
                pl.BlockSpec((1, Cin, P), lambda n: (n, 0, 0)),
                pl.BlockSpec((Cf, Cin), lambda n: (0, 0)),
                pl.BlockSpec((Cf, 1), lambda n: (0, 0)),
            ],
            out_specs=pl.BlockSpec((1, Cf, 1), lambda n: (n, 0, 0)),
        ),
        compiler_params=_mosaic_params(block_bytes),
    )(xds, wbbT, bbb)


# ---------------------------------------------------------------------------
# Model
# ---------------------------------------------------------------------------

class SimpleSegmentationModelPallas:
    def __init__(self, key, in_ch=4, feat_ch=32, num_classes=8):
        k1, k2, k3, k4, k5 = jax.random.split(key, 5)
        # backbone: 1x1 conv, stride 2, + ReLU   (C_in -> feat_ch)
        self.w_bb = (jax.random.normal(k1, (in_ch, feat_ch), jnp.float32)
                     / np.sqrt(in_ch))
        self.b_bb = 0.1 * jax.random.normal(k4, (feat_ch,), jnp.float32)
        # classifier: 1x1 conv                   (feat_ch -> num_classes)
        self.w_cls = (jax.random.normal(k2, (feat_ch, num_classes), jnp.float32)
                      / np.sqrt(feat_ch))
        self.b_cls = 0.1 * jax.random.normal(k5, (num_classes,), jnp.float32)
        self.position_indices = np.array(jax.random.permutation(k3, feat_ch))
        self.in_ch = in_ch
        self.feat_ch = feat_ch
        self.num_classes = num_classes
        self._jit_main = jax.jit(self._forward_main, static_argnames=("N",))
        self._jit_latent = jax.jit(self._forward_latent)

    # -- main segmentation path ---------------------------------------------
    def _forward_main(self, x, *, N):
        B, Cin, H, W = x.shape
        xds = x[:, :, ::2, ::2]                         # stride-2 "1x1 conv" sampling
        h, w = xds.shape[2], xds.shape[3]
        xds = xds.reshape(B, Cin, h * w).astype(jnp.float32)   # channel-first flat

        # features['out'][:, position_indices[:N], :, :] = 0  -> fold into w_cls
        mask = np.ones((self.feat_ch,), np.float32)
        if N > 0:
            mask[self.position_indices[:N]] = 0.0
        wclsT = (self.w_cls * jnp.asarray(mask)[:, None]).T      # (NC, Cf)

        wbbT = self.w_bb.T                                       # (Cf, Cin)
        bbb = self.b_bb.reshape(self.feat_ch, 1)
        bcls = self.b_cls.reshape(self.num_classes, 1)
        upmat = _upsample_matrix(h, w, H, W)                     # (h*w, H*W)

        out = _fused_forward_call(xds, wbbT, bbb, wclsT, bcls, upmat,
                                  self.num_classes)              # (B, NC, H*W)
        return out.reshape(B, self.num_classes, H, W)            # NCHW, free reshape

    # -- latent path ----------------------------------------------------------
    def _forward_latent(self, x):
        B, Cin, H, W = x.shape
        # flip == fliplr(x.permute(0,3,2,1)).permute(0,3,2,1) == reverse W axis
        xcat = jnp.concatenate([x, x[:, :, :, ::-1]], axis=0)    # (2B, Cin, H, W)
        xds = xcat[:, :, ::2, ::2]
        h, w = xds.shape[2], xds.shape[3]
        xds = xds.reshape(2 * B, Cin, h * w).astype(jnp.float32)
        wbbT = self.w_bb.T
        bbb = self.b_bb.reshape(self.feat_ch, 1)
        pooled = _latent_call(xds, wbbT, bbb)                    # (2B, Cf, 1)
        pooled = pooled.reshape(2 * B, self.feat_ch, 1, 1)
        return pooled[:B], pooled[B:]

    def forward(self, x, latent=False, N=0):
        if latent:
            return self._jit_latent(x)
        return self._jit_main(x, N=int(N))


# ---------------------------------------------------------------------------
# Pure-JAX references for verification
# ---------------------------------------------------------------------------

def reference_forward(model, x, N=0):
    B, Cin, H, W = x.shape
    xds = x[:, :, ::2, ::2]
    h, w = xds.shape[2], xds.shape[3]
    feat = jax.nn.relu(jnp.einsum('bchw,cf->bfhw', xds, model.w_bb,
                                  precision='highest')
                       + model.b_bb[None, :, None, None])
    mask = np.ones(model.feat_ch, np.float32)
    if N > 0:
        mask[np.array(model.position_indices[:N])] = 0.0
    feat = feat * jnp.asarray(mask)[None, :, None, None]
    logits = (jnp.einsum('bfhw,fk->bkhw', feat, model.w_cls, precision='highest')
              + model.b_cls[None, :, None, None])
    Wh = jnp.asarray(_bilinear_matrix(H, h))
    Ww = jnp.asarray(_bilinear_matrix(W, w))
    up = jnp.einsum('oh,bkhw->bkow', Wh, logits, precision='highest')
    up = jnp.einsum('pw,bkow->bkop', Ww, up, precision='highest')
    return up                                                     # (B, NC, H, W)


def reference_latent(model, x):
    def bb(xx):
        xds = xx[:, :, ::2, ::2]
        return jax.nn.relu(jnp.einsum('bchw,cf->bfhw', xds, model.w_bb,
                                      precision='highest')
                           + model.b_bb[None, :, None, None])
    lat1 = bb(x).mean(axis=(2, 3), keepdims=True)
    lat2 = bb(x[:, :, :, ::-1]).mean(axis=(2, 3), keepdims=True)
    return lat1, lat2


if __name__ == "__main__":
    key = jax.random.PRNGKey(0)
    kx, kp = jax.random.split(key)
    model = SimpleSegmentationModelPallas(kp, in_ch=4, feat_ch=32, num_classes=8)

    x = jax.random.normal(kx, (2, 4, 16, 16), jnp.float32)   # NCHW input

    # main segmentation path (exercise the channel-zeroing with N=2)
    out = jax.block_until_ready(model.forward(x, latent=False, N=2))
    assert out.shape == (2, 8, 16, 16), out.shape
    ref = reference_forward(model, x, N=2)
    err = float(jnp.max(jnp.abs(out - ref)))
    assert err < 5e-4, err

    # latent path (global avg-pool of features of x and of horizontally-flipped x)
    lat1, lat2 = model.forward(x, latent=True)
    jax.block_until_ready((lat1, lat2))
    assert lat1.shape == (2, 32, 1, 1) and lat2.shape == (2, 32, 1, 1)
    r1, r2 = reference_latent(model, x)
    assert float(jnp.max(jnp.abs(lat1 - r1))) < 1e-4
    assert float(jnp.max(jnp.abs(lat2 - r2))) < 1e-4

    print("KERNEL_OK")
</pallas_src>

<mosaic_0001>
module attributes {stable_mosaic.version = 11 : i64} {
  func.func @_fused_forward_kernel(%arg0: i32, %arg1: memref<1x4x64xf32, #tpu.memory_space<vmem>>, %arg2: memref<32x4xf32, #tpu.memory_space<vmem>>, %arg3: memref<32x1xf32, #tpu.memory_space<vmem>>, %arg4: memref<8x32xf32, #tpu.memory_space<vmem>>, %arg5: memref<8x1xf32, #tpu.memory_space<vmem>>, %arg6: memref<64x256xf32, #tpu.memory_space<vmem>>, %arg7: memref<1x8x256xf32, #tpu.memory_space<vmem>>) attributes {dimension_semantics = [#tpu.dimension_semantics<parallel>], iteration_bounds = array<i64: 2>, scalar_prefetch = 0 : i64, scratch_operands = 0 : i64, tpu.core_type = #tpu.core_type<tc>, window_params = [{transform_indices = @transform_0, window_bounds = array<i64: 1, 4, 64>}, {pipeline_mode = #tpu.pipeline_mode<synchronous>, transform_indices = @transform_1, window_bounds = array<i64: 32, 4>}, {pipeline_mode = #tpu.pipeline_mode<synchronous>, transform_indices = @transform_2, window_bounds = array<i64: 32, 1>}, {pipeline_mode = #tpu.pipeline_mode<synchronous>, transform_indices = @transform_3, window_bounds = array<i64: 8, 32>}, {pipeline_mode = #tpu.pipeline_mode<synchronous>, transform_indices = @transform_4, window_bounds = array<i64: 8, 1>}, {pipeline_mode = #tpu.pipeline_mode<synchronous>, transform_indices = @transform_5, window_bounds = array<i64: 64, 256>}, {transform_indices = @transform_6, window_bounds = array<i64: 1, 8, 256>}]} {
    %c0 = arith.constant 0 : index
    %c0_0 = arith.constant 0 : index
    %c0_1 = arith.constant 0 : index
    %0 = vector.load %arg1[%c0, %c0_0, %c0_1] : memref<1x4x64xf32, #tpu.memory_space<vmem>>, vector<1x4x64xf32>
    %1 = vector.shape_cast %0 : vector<1x4x64xf32> to vector<4x64xf32>
    %c0_2 = arith.constant 0 : index
    %c0_3 = arith.constant 0 : index
    %2 = vector.load %arg2[%c0_2, %c0_3] : memref<32x4xf32, #tpu.memory_space<vmem>>, vector<32x4xf32>
    %cst = arith.constant dense<0.000000e+00> : vector<32x64xf32>
    %3 = tpu.matmul %2, %1, %cst {dimension_numbers = #tpu.dot_dimension_numbers<[1], [0], [0], [1], [0, 0, 1, 1], [], []>} : vector<32x4xf32>, vector<4x64xf32>, vector<32x64xf32> -> vector<32x64xf32>
    %c0_4 = arith.constant 0 : index
    %c0_5 = arith.constant 0 : index
    %4 = vector.load %arg3[%c0_4, %c0_5] : memref<32x1xf32, #tpu.memory_space<vmem>>, vector<32x1xf32>
    %5 = vector.broadcast %4 : vector<32x1xf32> to vector<32x64xf32>
    %6 = arith.addf %3, %5 : vector<32x64xf32>
    %cst_6 = arith.constant 0.000000e+00 : f32
    %7 = vector.broadcast %cst_6 : f32 to vector<32x64xf32>
    %8 = arith.maximumf %6, %7 : vector<32x64xf32>
    %c0_7 = arith.constant 0 : index
    %c0_8 = arith.constant 0 : index
    %9 = vector.load %arg4[%c0_7, %c0_8] : memref<8x32xf32, #tpu.memory_space<vmem>>, vector<8x32xf32>
    %cst_9 = arith.constant dense<0.000000e+00> : vector<8x64xf32>
    %10 = tpu.matmul %9, %8, %cst_9 {dimension_numbers = #tpu.dot_dimension_numbers<[1], [0], [0], [1], [0, 0, 1, 1], [], []>} : vector<8x32xf32>, vector<32x64xf32>, vector<8x64xf32> -> vector<8x64xf32>
    %c0_10 = arith.constant 0 : index
    %c0_11 = arith.constant 0 : index
    %11 = vector.load %arg5[%c0_10, %c0_11] : memref<8x1xf32, #tpu.memory_space<vmem>>, vector<8x1xf32>
    %12 = vector.broadcast %11 : vector<8x1xf32> to vector<8x64xf32>
    %13 = arith.addf %10, %12 : vector<8x64xf32>
    %c0_12 = arith.constant 0 : index
    %c0_13 = arith.constant 0 : index
    %14 = vector.load %arg6[%c0_12, %c0_13] : memref<64x256xf32, #tpu.memory_space<vmem>>, vector<64x256xf32>
    %cst_14 = arith.constant dense<0.000000e+00> : vector<8x256xf32>
    %15 = tpu.matmul %13, %14, %cst_14 {dimension_numbers = #tpu.dot_dimension_numbers<[1], [0], [0], [1], [0, 0, 1, 1], [], []>} : vector<8x64xf32>, vector<64x256xf32>, vector<8x256xf32> -> vector<8x256xf32>
    %c0_15 = arith.constant 0 : index
    %c0_16 = arith.constant 0 : index
    %c0_17 = arith.constant 0 : index
    %16 = vector.load %arg7[%c0_15, %c0_16, %c0_17] : memref<1x8x256xf32, #tpu.memory_space<vmem>>, vector<1x8x256xf32>
    %17 = vector.shape_cast %16 : vector<1x8x256xf32> to vector<8x256xf32>
    %18 = vector.shape_cast %15 : vector<8x256xf32> to vector<1x8x256xf32>
    tpu.vector_store %arg7[%c0_15, %c0_16, %c0_17], %18 {strides = array<i32>} : memref<1x8x256xf32, #tpu.memory_space<vmem>>, vector<1x8x256xf32>,
    return
  }
  func.func @transform_0(%arg0: i32) -> (i32, i32, i32) {
    %c0_i32 = arith.constant 0 : i32
    %c0_i32_0 = arith.constant 0 : i32
    %c0_i32_1 = arith.constant 0 : i32
    return %arg0, %c0_i32, %c0_i32_0 : i32, i32, i32
  }
  func.func @transform_1(%arg0: i32) -> (i32, i32) {
    %c0_i32 = arith.constant 0 : i32
    %c0_i32_0 = arith.constant 0 : i32
    %c0_i32_1 = arith.constant 0 : i32
    return %c0_i32, %c0_i32_0 : i32, i32
  }
  func.func @transform_2(%arg0: i32) -> (i32, i32) {
    %c0_i32 = arith.constant 0 : i32
    %c0_i32_0 = arith.constant 0 : i32
    %c0_i32_1 = arith.constant 0 : i32
    return %c0_i32, %c0_i32_0 : i32, i32
  }
  func.func @transform_3(%arg0: i32) -> (i32, i32) {
    %c0_i32 = arith.constant 0 : i32
    %c0_i32_0 = arith.constant 0 : i32
    %c0_i32_1 = arith.constant 0 : i32
    return %c0_i32, %c0_i32_0 : i32, i32
  }
  func.func @transform_4(%arg0: i32) -> (i32, i32) {
    %c0_i32 = arith.constant 0 : i32
    %c0_i32_0 = arith.constant 0 : i32
    %c0_i32_1 = arith.constant 0 : i32
    return %c0_i32, %c0_i32_0 : i32, i32
  }
  func.func @transform_5(%arg0: i32) -> (i32, i32) {
    %c0_i32 = arith.constant 0 : i32
    %c0_i32_0 = arith.constant 0 : i32
    %c0_i32_1 = arith.constant 0 : i32
    return %c0_i32, %c0_i32_0 : i32, i32
  }
  func.func @transform_6(%arg0: i32) -> (i32, i32, i32) {
    %c0_i32 = arith.constant 0 : i32
    %c0_i32_0 = arith.constant 0 : i32
    %c0_i32_1 = arith.constant 0 : i32
    return %arg0, %c0_i32, %c0_i32_0 : i32, i32, i32
  }
}

</mosaic_0001>

<bundles_post_ra>
// kernel: _forward_main.1
= control target key start
LH: loop header
LB: loop body
LE: loop exit
PB: predicated region body
PF: predicated region fallthrough
CT: control target
= control target key end

     0   :  { %11 = vsyncpa [#allocation3], 0  ;;  %s627_s21 = smov 0   ;;  %s730_s0 = inlined_call_operand.vmem [shape: f32[2,4,64], index: 0, kind: input, shape index: {}]   ;;  %s731_s1 = inlined_call_operand.vmem [shape: f32[32,4], index: 1, kind: input, shape index: {}]   ;;  %s732_s2 = inlined_call_operand.vmem [shape: f32[32,1], index: 2, kind: input, shape index: {}]   ;;  %s733_s3 = inlined_call_operand.vmem [shape: f32[8,32], index: 3, kind: input, shape index: {}]   ;;  %s734_s4 = inlined_call_operand.hbm [shape: f32[8,1], index: 4, kind: input, shape index: {}]   ;;  %s735_s5 = inlined_call_operand.vmem [shape: f32[64,256], index: 5, kind: input, shape index: {}]   ;;  %s736_s6 = inlined_call_operand.vmem [shape: f32[2,8,256], index: 6, kind: output, shape index: {}]  }
   0x1 LB: > { %s503_s22 = sadd.s32 4294967295, %s588_s21   ;;  %p505_p0 = scmp.ge.s32.totalorder %s588_s21, 1  ;;  %s588_s21 = sphi %s627_s21, %s17_s21  }
   0x2   : > { %p179_p1 = scmp.lt.s32.totalorder %s588_s21, 3  ;;  %s200_s25 = sshll.u32 %s734_s4, 4  ;;  %s201_s25 = int_to_ptr.hbm [resolvable:$true] %s200_s25 }
   0x3   : > { %p533_p3 = scmp.eq.s32.totalorder %s503_s22, 0  ;;  %s590_s26 = smov [#allocation2]  }
   0x4   : > { %p180_p2 = pnand %p505_p0, %p179_p1  ;;  %s202_s27 = sshll.u32 %s590_s26, 4  ;;  %s203_s27 = int_to_ptr.vmem [resolvable:$true] %s202_s27 }
   0x6   : > { %p529_p4 = pneg %p180_p2  ;;  %225 = sbr.rel (%p180_p2) target bundleno = 432 (0x1b0), region = 44 }
   0x8   : > { %p530_p5 = pnand %p533_p3, %p529_p4 }
   0xa   : > { %532 = dma.hbm_to_vmem [thread:$0]  (!%p530_p5), %s201_s25, 128, %s203_s27, [#allocation3]  }
   0xb   : > { %583 = dma.done.wait (%p533_p3), [#allocation3], 128  }
   0xc   : > { %585 = vsyncadd (%p533_p3), [#allocation3], 4294967168  ;;  %p255_p6 = scmp.lt.s32.totalorder %s503_s22, 1  ;;  %v591_v0 = vmov 0   ;;  %vm306_vm0 = vcmask 1043456   ;;  %vm293_vm1 = vcmask 31744  }
   0xd   : > { %546 = vset.pattern.permute.xlu1 %v591_v0  ;;  %545 = vset.pattern.permute.xlu0 %v591_v0  ;;  %v265_v2 = vld [vmem:[%s731_s1] sm:$0xff]  ;;  %v270_v3 = vld [vmem:[%s732_s2 + $0x8] sm:$0xff]  ;;  %v268_v4 = vld [vmem:[%s731_s1 + $0x18] sm:$0xff]  ;;  %vm350_vm2 = vcmask 261120   ;;  %vm390_vm3 = vcmask 523264  }
   0xe   : > { %s738_s22 = smov (!%p255_p6, %s503_s22), 1  ;;  %547 = vset.pattern.permute.xlu2 %v591_v0  ;;  %280 = vperm.xlu1 %546, %v270_v3   ;;  %v272_v5 = vld [vmem:[%s732_s2 + $0x18] sm:$0xff]  ;;  %v269_v6 = vld [vmem:[%s732_s2] sm:$0xff]  ;;  %v266_v7 = vld [vmem:[%s731_s1 + $0x8] sm:$0xff] }
   0xf   : > { %s510_s28 = sshll.u32 %s738_s22, 2  ;;  %290 = vperm.xlu0 %545, %v272_v5   ;;  %v271_v8 = vld [vmem:[%s732_s2 + $0x10] sm:$0xff]  ;;  %v344_v10 = vld [vmem:[#allocation2] sm:$0xff]  ;;  %v389_v12 = vld [vmem:[%s735_s5 + $0x78] sm:$0xff]  ;;  %s523_s14 = sshll.u32 %s738_s22, 4 }
  0x10   : > { %s258_s7 = scalar_lea.vmem %s730_s0, %s510_s28  ;;  %v267_v9 = vld [vmem:[%s731_s1 + $0x10] sm:$0xff]  ;;  %347 = vperm.xlu2 %547, %v344_v10   ;;  %v386_v13 = vld [vmem:[%s735_s5 + $0x60] sm:$0xff]  ;;  %v387_v14 = vld [vmem:[%s735_s5 + $0x68] sm:$0xff]  ;;  %422 = vmatpush.msra.mxu3 %v389_v12  ;;  %s263_s17 = scalar_lea.vmem %s736_s6, %s523_s14 }
  0x11   : > { %v264_v1 = vld [vmem:[%s258_s7] sm:$0xf]  ;;  %v388_v11 = vld [vmem:[%s735_s5 + $0x70] sm:$0xff]  ;;  %v385_v16 = vld [vmem:[%s735_s5 + $0x58] sm:$0xff] }
  0x12   : > { %513 = vmatpush.msk.msra.mxu0 %vm306_vm0, %v264_v1  ;;  %524 = vmatpush.msk.msra.mxu1 %vm306_vm0, %v264_v1  ;;  %v384_v15 = vld [vmem:[%s735_s5 + $0x50] sm:$0xff]  ;;  %v382_v17 = vld [vmem:[%s735_s5 + $0x40] sm:$0xff]  ;;  %v383_v18 = vld [vmem:[%s735_s5 + $0x48] sm:$0xff] }
  0x13   : > { %514 = vmatmul.msk.f32.vlgmr.msra.gmra.mxu0 %vm293_vm1, %v265_v2  ;;  %517 = vmatmul.msk.f32.vlgmr.msra.gmra.mxu1 %vm293_vm1, %v268_v4  ;;  %v380_v20 = vld [vmem:[%s735_s5 + $0x30] sm:$0xff]  ;;  %v381_v23 = vld [vmem:[%s735_s5 + $0x38] sm:$0xff]  ;;  %v378_v25 = vld [vmem:[%s735_s5 + $0x20] sm:$0xff] }
  0x14   : > { %402 = vmatpush.msra.mxu2 %v388_v11  ;;  %423 = vmatpush.msra.mxu3 %v387_v14  ;;  %v379_v26 = vld [vmem:[%s735_s5 + $0x28] sm:$0xff]  ;;  %v376_v28 = vld [vmem:[%s735_s5 + $0x10] sm:$0xff]  ;;  %v377_v30 = vld [vmem:[%s735_s5 + $0x18] sm:$0xff] }
  0x15   : > { %v343_v41 = vld [vmem:[%s733_s3] sm:$0xff]  ;;  %v375_v43 = vld [vmem:[%s735_s5 + $0x8] sm:$0xff] }
  0x16   : > { %275 = vperm.xlu1 %546, %v269_v6   ;;  %403 = vmatpush.msra.mxu2 %v386_v13  ;;  %v374_v42 = vld [vmem:[%s735_s5] sm:$0xff] }
  0x17   : > { %285 = vperm.xlu0 %545, %v271_v8   ;;  %424 = vmatpush.msra.mxu3 %v385_v16 }
  0x18   : > { %404 = vmatpush.msra.mxu2 %v384_v15 }
  0x19   : > { %425 = vmatpush.msra.mxu3 %v383_v18 }
  0x1a   : > { %405 = vmatpush.msra.mxu2 %v382_v17 }
  0x1b   : > { %515 = vmatmul.msk.f32.gmra.mxu0 %vm293_vm1, %v266_v7  ;;  %426 = vmatpush.msra.mxu3 %v381_v23 }
  0x1c   : > { %406 = vmatpush.msra.mxu2 %v380_v20 }
  0x1d   : > { %427 = vmatpush.msra.mxu3 %v379_v26 }
  0x1e   : > { %407 = vmatpush.msra.mxu2 %v378_v25 }
  0x1f   : > { %428 = vmatpush.msra.mxu3 %v377_v30 }
  0x20   : > { %408 = vmatpush.msra.mxu2 %v376_v28 }
  0x21   : > { %429 = vmatpush.msra.mxu3 %v375_v43 }
  0x22   : > { %409 = vmatpush.msra.mxu2 %v374_v42 }
  0x23   : > { %516 = vmatmul.msk.f32.gmra.mxu0 %vm293_vm1, %v267_v9 }
  0x6a   : > { %v348_v44 = vpop.permute.xlu2 %347 }
  0x80   : > { %v281_v29 = vpop.permute.xlu1 %280 }
  0x81   : > { %v291_v21 = vpop.permute.xlu0 %290 }
  0x88   : > { %v276_v32 = vpop.permute.xlu1 %275 }
  0x89   : > { %v286_v33 = vpop.permute.xlu0 %285 }
  0x90   : > { %v327_v19 = vpop.f32.mrf.mxu0  ;;  %v336_v22 = vpop.f32.mrf.mxu1 }
  0x91   : > { %v337_v24 = vadd.f32 %v336_v22, %v291_v21  ;;  %v328_v37 = vadd.f32 %v327_v19, %v276_v32 }
  0x93   : > { %v342_v27 = vmax.f32 %v337_v24, 0.0  ;;  %v339_v40 = vmax.f32 %v328_v37, 0.0 }
  0x95   : > { %366 = vmatpush.msrb.mxu1 %v342_v27 }
  0x98   : > { %v330_v31 = vpop.f32.mrf.mxu0 }
  0x99   : > { %v331_v35 = vadd.f32 %v330_v31, %v281_v29 }
  0x9b   : > { %v340_v39 = vmax.f32 %v331_v35, 0.0 }
  0xa0   : > { %v333_v34 = vpop.f32.mrf.mxu0 }
  0xa1   : > { %v334_v36 = vadd.f32 %v333_v34, %v286_v33 }
  0xa3   : > { %v341_v38 = vmax.f32 %v334_v36, 0.0 }
  0xa5   : > { %367 = vmatpush.msrb.mxu1 %v341_v38 }
  0xa7   : > { %368 = vmatpush.msrb.mxu1 %v340_v39 }
  0xa9   : > { %369 = vmatpush.msrb.mxu1 %v339_v40 }
  0xaa   : > { %518 = vmatmul.msk.f32.vlgmr.msrb.gmra.mxu1 %vm350_vm2, %v343_v41 }
 0x127   : > { %v371_v45 = vpop.f32.mrf.mxu1 }
 0x128   : > { %v372_v46 = vadd.f32 %v371_v45, %v348_v44 }
 0x12a   : > { %519 = vmatmul.msk.f32.vlgmr.msra.gmra.mxu2 %vm390_vm3, %v372_v46  ;;  %520 = vmatmul.msk.f32.vlgmr.msra.gmra.mxu3 %vm390_vm3, %v372_v46 }
 0x1ad   : > { %v411_v47 = vpop.f32.mrf.mxu2  ;;  %v431_v48 = vpop.f32.mrf.mxu3 }
 0x1ae   : > { %434 = vst [vmem:[%s263_s17] sm:$0xff] %v411_v47 }
 0x1af   : > { %435 = vst [vmem:[%s263_s17 + $0x8] sm:$0xff] %v431_v48 }
 0x1b0 PF: > { %s17_s21 = sadd.s32 1, %s588_s21  }
 0x1b1   : > { %p14_p7 = scmp.ge.s32.totalorder %s17_s21, 4  }
 0x1b3   :  { %16 = sbr.rel (!%p14_p7) target bundleno = 1 (0x1), region = 79 }
 0x1b8   :  { %457 = vsyncpa [#allocation3], 1 }
 0x1b9   :  { %459 = vsyncpa [#allocation3 + $0x1], 1 }

</bundles_post_ra>
